<compile_context>
chip_gen: v6e
topology: v6e:2x2x1
jax: 0.10.0
libtpu: 0.0.40
codegen_flags: <defaults>
</compile_context>

<pallas_src>
import functools
import math

import jax
import jax.numpy as jnp
from jax import lax
from jax.experimental import pallas as pl
from jax.experimental.pallas import tpu as pltpu

EPS = 1e-5  # BatchNorm1d default eps


# ------------------------------ tile selection --------------------------------
def _pick_tile_n(n, f_in, f_out, use_h0, target=256,
                 vmem_budget=24 * 1024 * 1024):
    """Largest N-tile <= target that divides n, is a multiple of 8 (f32 sublane),
    and whose double-buffered footprint (x, [h0], y tiles + resident W) fits the
    budget (kept well under v7x's 64 MiB VMEM / ~32 MiB scoped default)."""
    if n <= target:
        return n

    def fits(t):
        per_tile = t * (f_in * (2 if use_h0 else 1) + f_out) * 4
        return 2 * per_tile + f_in * f_out * 4 + 2 * f_out * 4 <= vmem_budget

    t = (target // 8) * 8
    while t >= 8:
        if n % t == 0 and fits(t):
            return t
        t -= 8
    return n  # fall back to a single monolithic block


def _vmem_limit(est_bytes):
    # explicit limit with headroom; capped at 48 MiB so it is safe on v7x (64 MiB).
    return int(min(48 * 1024 * 1024, max(16 * 1024 * 1024, 2 * est_bytes)))


# ------------------------------ pass 1 kernel ----------------------------------
def _matmul_stats_kernel(*refs, apply_prelu, use_h0):
    """Per N-tile: [prelu] -> [+h0] -> matmul; emit y tile + accumulate BN stats."""
    i = 0
    x_ref = refs[i]; i += 1
    h0_ref = None
    if use_h0:
        h0_ref = refs[i]; i += 1
    w_ref = refs[i]; i += 1
    alpha_ref = None
    if apply_prelu:
        alpha_ref = refs[i]; i += 1
    y_ref, stats_ref = refs[i], refs[i + 1]

    x = x_ref[...]
    if apply_prelu:
        a = alpha_ref[0]
        x = jnp.where(x > 0, x, a * x)
    support = x + h0_ref[...] if use_h0 else x

    # MXU matmul with f32 accumulation; weight block is resident across the grid.
    y = jnp.dot(support, w_ref[...], preferred_element_type=jnp.float32)
    y_ref[...] = y.astype(y_ref.dtype)

    # Batch-statistics accumulator: the stats output block index is constant
    # across the N grid axis, so it stays resident in VMEM (axis = "arbitrary").
    @pl.when(pl.program_id(0) == 0)
    def _():
        stats_ref[...] = jnp.zeros_like(stats_ref)

    stats_ref[0:1, :] += jnp.sum(y, axis=0, keepdims=True)        # sum(y)
    stats_ref[1:2, :] += jnp.sum(y * y, axis=0, keepdims=True)    # sum(y*y)


def _layer_matmul_stats(x, h0, w, alpha, *, apply_prelu, use_h0, tile_n):
    n, f_in = x.shape
    f_out = w.shape[1]
    itemsize = jnp.dtype(x.dtype).itemsize
    grid = (n // tile_n,)

    in_specs = [pl.BlockSpec((tile_n, f_in), lambda i: (i, 0))]        # x tile
    args = [x]
    if use_h0:
        in_specs.append(pl.BlockSpec((tile_n, f_in), lambda i: (i, 0)))  # h0 tile
        args.append(h0)
    in_specs.append(pl.BlockSpec((f_in, f_out), lambda i: (0, 0)))     # W resident
    args.append(w)
    if apply_prelu:
        in_specs.append(pl.BlockSpec(memory_space=pltpu.MemorySpace.SMEM))  # alpha
        args.append(alpha)

    out_shape = (jax.ShapeDtypeStruct((n, f_out), jnp.float32),        # y
                 jax.ShapeDtypeStruct((2, f_out), jnp.float32))        # [sum, sumsq]
    out_specs = (pl.BlockSpec((tile_n, f_out), lambda i: (i, 0)),
                 pl.BlockSpec((2, f_out), lambda i: (0, 0)))           # resident acc

    bytes_accessed = ((n * f_in * (2 if use_h0 else 1) + f_in * f_out) * itemsize
                      + (n * f_out + 2 * f_out) * 4)
    cost = pl.CostEstimate(flops=2 * n * f_in * f_out + 4 * n * f_out,
                           transcendentals=0, bytes_accessed=bytes_accessed)

    est = (2 * tile_n * (f_in * (2 if use_h0 else 1) + f_out) * itemsize
           + f_in * f_out * itemsize + 2 * f_out * 4)
    kernel = functools.partial(_matmul_stats_kernel,
                               apply_prelu=apply_prelu, use_h0=use_h0)
    return pl.pallas_call(
        kernel,
        out_shape=out_shape,
        grid=grid,
        in_specs=in_specs,
        out_specs=out_specs,
        compiler_params=pltpu.CompilerParams(
            dimension_semantics=("arbitrary",),   # stats accumulate across N tiles
            vmem_limit_bytes=_vmem_limit(est)),
        cost_estimate=cost,
    )(*args)


# ------------------------------ pass 2 kernel ----------------------------------
def _bn_residual_kernel(*refs, apply_prelu, residual, n_rows):
    """Per N-tile: apply BatchNorm1d (batch stats) and the optional residual."""
    i = 0
    y_ref = refs[i]; i += 1
    stats_ref = refs[i]; i += 1
    gamma_ref = refs[i]; i += 1
    beta_ref = refs[i]; i += 1
    x_ref = None
    alpha_ref = None
    if residual:
        x_ref = refs[i]; i += 1
        if apply_prelu:
            alpha_ref = refs[i]; i += 1
    out_ref = refs[i]

    inv_n = 1.0 / n_rows
    mean = stats_ref[0:1, :] * inv_n                       # (1, F_out)
    var = stats_ref[1:2, :] * inv_n - mean * mean          # biased (BN training mode)
    scale = lax.rsqrt(var + EPS) * gamma_ref[...]          # rsqrt -> EUP slot
    out = (y_ref[...] - mean) * scale + beta_ref[...]

    if residual:
        x = x_ref[...]
        if apply_prelu:                                    # recompute prelu(x) (cheap)
            a = alpha_ref[0]
            x = jnp.where(x > 0, x, a * x)
        out = out + x
    out_ref[...] = out.astype(out_ref.dtype)


def _layer_bn_residual(y, stats, gamma, beta, x, alpha, *,
                       apply_prelu, residual, tile_n):
    n, f_out = y.shape
    grid = (n // tile_n,)

    in_specs = [pl.BlockSpec((tile_n, f_out), lambda i: (i, 0)),   # y tile
                pl.BlockSpec((2, f_out), lambda i: (0, 0)),        # stats (resident)
                pl.BlockSpec((1, f_out), lambda i: (0, 0)),        # gamma
                pl.BlockSpec((1, f_out), lambda i: (0, 0))]        # beta
    args = [y, stats, gamma, beta]
    if residual:
        in_specs.append(pl.BlockSpec((tile_n, x.shape[1]), lambda i: (i, 0)))
        args.append(x)
        if apply_prelu:
            in_specs.append(pl.BlockSpec(memory_space=pltpu.MemorySpace.SMEM))
            args.append(alpha)

    res_bytes = (n * x.shape[1] * jnp.dtype(x.dtype).itemsize) if residual else 0
    cost = pl.CostEstimate(flops=(6 + (2 if residual else 0)) * n * f_out,
                           transcendentals=f_out,
                           bytes_accessed=2 * n * f_out * 4 + 4 * f_out * 4 + res_bytes)

    est = (2 * tile_n * f_out * 4 * 2 + (2 * tile_n * x.shape[1] * 4 if residual else 0)
           + 6 * f_out * 4)
    kernel = functools.partial(_bn_residual_kernel, apply_prelu=apply_prelu,
                               residual=residual, n_rows=float(n))
    return pl.pallas_call(
        kernel,
        out_shape=jax.ShapeDtypeStruct((n, f_out), jnp.float32),
        grid=grid,
        in_specs=in_specs,
        out_specs=pl.BlockSpec((tile_n, f_out), lambda i: (i, 0)),
        compiler_params=pltpu.CompilerParams(
            dimension_semantics=("parallel",),    # independent tiles -> megacore on v7x
            vmem_limit_bytes=_vmem_limit(est)),
        cost_estimate=cost,
    )(*args)


# ------------------------------- one fused layer --------------------------------
def ffn_layer(x, h0, w, gamma, beta, alpha, *, apply_prelu, use_h0, residual,
              tile_n_target=256):
    n, f_in = x.shape
    f_out = w.shape[1]
    tile_n = _pick_tile_n(n, f_in, f_out, use_h0, target=tile_n_target)
    y, stats = _layer_matmul_stats(x, h0, w, alpha,
                                   apply_prelu=apply_prelu, use_h0=use_h0,
                                   tile_n=tile_n)
    return _layer_bn_residual(y, stats, gamma, beta, x, alpha,
                              apply_prelu=apply_prelu, residual=residual,
                              tile_n=tile_n)


# ----------------------------- parameter building -------------------------------
def init_params(key, in_feats, hidden, out_feats, n_layers):
    assert n_layers >= 2, "n_layers == 1 path not implemented"
    keys = jax.random.split(key, n_layers)

    def uniform_w(k, fin, fout):
        stdv = 1.0 / math.sqrt(fout)   # Dense and denseresidualayer both use 1/sqrt(out)
        return jax.random.uniform(k, (fin, fout), jnp.float32, -stdv, stdv)

    params = [(uniform_w(keys[0], in_feats, hidden),
               jnp.ones((1, hidden), jnp.float32),
               jnp.zeros((1, hidden), jnp.float32))]
    for i in range(1, n_layers - 1):
        params.append((uniform_w(keys[i], hidden, hidden),
                       jnp.ones((1, hidden), jnp.float32),
                       jnp.zeros((1, hidden), jnp.float32)))
    params.append((uniform_w(keys[-1], hidden, out_feats),
                   jnp.ones((1, out_feats), jnp.float32),
                   jnp.zeros((1, out_feats), jnp.float32)))
    alpha = jnp.array([0.25], dtype=jnp.float32)   # nn.PReLU default init
    return params, alpha


# -------------------------------- full forward ----------------------------------
def ffn_forward(x, params, alpha, *, in_feats, hidden, out_feats, n_layers,
                tile_n=256):
    w0, g0, b0 = params[0]
    x = ffn_layer(x, None, w0, g0, b0, alpha,
                  apply_prelu=False, use_h0=False,
                  residual=(in_feats == hidden), tile_n_target=tile_n)
    h0 = x
    for lid in range(1, n_layers - 1):
        w, g, b = params[lid]
        x = ffn_layer(x, h0, w, g, b, alpha,
                      apply_prelu=True, use_h0=True, residual=True,
                      tile_n_target=tile_n)
    wl, gl, bl = params[n_layers - 1]
    x = ffn_layer(x, None, wl, gl, bl, alpha,
                  apply_prelu=True, use_h0=False,
                  residual=(hidden == out_feats), tile_n_target=tile_n)
    return x


# ----------------------------- pure-JAX reference --------------------------------
def _bn_ref(y, gamma, beta):
    mean = y.mean(0, keepdims=True)
    var = ((y - mean) ** 2).mean(0, keepdims=True)
    return (y - mean) / jnp.sqrt(var + EPS) * gamma + beta


def _prelu_ref(x, a):
    return jnp.where(x > 0, x, a * x)


def ffn_forward_ref(x, params, alpha, *, in_feats, hidden, out_feats, n_layers):
    a = alpha[0]
    w0, g0, b0 = params[0]
    y = _bn_ref(x @ w0, g0, b0)
    if in_feats == hidden:
        y = y + x
    x = y
    h0 = x
    for lid in range(1, n_layers - 1):
        w, g, b = params[lid]
        xi = _prelu_ref(x, a)
        x = _bn_ref((xi + h0) @ w, g, b) + xi
    wl, gl, bl = params[n_layers - 1]
    xi = _prelu_ref(x, a)
    y = _bn_ref(xi @ wl, gl, bl)
    if hidden == out_feats:
        y = y + xi
    return y


# --------------------------------------- main ------------------------------------
if __name__ == "__main__":
    # (N, in_feats, hidden, out_feats, n_layers)
    configs = [
        (512, 128, 128, 64, 4),    # in == hidden -> layer-0 residual; multi-tile grid
        (256, 64, 128, 128, 3),    # hidden == out -> last-layer residual
    ]
    key = jax.random.PRNGKey(0)
    for (N, IN_F, HID, OUT_F, L) in configs:
        key, kx, kp = jax.random.split(key, 3)
        x = jax.random.normal(kx, (N, IN_F), dtype=jnp.float32)
        params, alpha = init_params(kp, IN_F, HID, OUT_F, L)

        out = ffn_forward(x, params, alpha, in_feats=IN_F, hidden=HID,
                          out_feats=OUT_F, n_layers=L, tile_n=256)
        out = jax.block_until_ready(out)

        ref = ffn_forward_ref(x, params, alpha, in_feats=IN_F, hidden=HID,
                              out_feats=OUT_F, n_layers=L)
        assert out.shape == (N, OUT_F)
        max_err = float(jnp.max(jnp.abs(out - ref)))
        assert jnp.allclose(out, ref, rtol=5e-4, atol=5e-4), \
            f"mismatch vs reference (max abs err {max_err})"

    print("KERNEL_OK")
</pallas_src>

<mosaic_0001>
module attributes {stable_mosaic.version = 11 : i64} {
  func.func @_matmul_stats_kernel(%arg0: i32, %arg1: memref<256x128xf32, #tpu.memory_space<vmem>>, %arg2: memref<128x128xf32, #tpu.memory_space<vmem>>, %arg3: memref<256x128xf32, #tpu.memory_space<vmem>>, %arg4: memref<2x128xf32, #tpu.memory_space<vmem>>) attributes {dimension_semantics = [#tpu.dimension_semantics<arbitrary>], iteration_bounds = array<i64: 2>, scalar_prefetch = 0 : i64, scratch_operands = 0 : i64, tpu.core_type = #tpu.core_type<tc>, window_params = [{transform_indices = @transform_0, window_bounds = array<i64: 256, 128>}, {pipeline_mode = #tpu.pipeline_mode<synchronous>, transform_indices = @transform_1, window_bounds = array<i64: 128, 128>}, {transform_indices = @transform_2, window_bounds = array<i64: 256, 128>}, {pipeline_mode = #tpu.pipeline_mode<synchronous>, transform_indices = @transform_3, window_bounds = array<i64: 2, 128>}]} {
    %c0 = arith.constant 0 : index
    %c0_0 = arith.constant 0 : index
    %0 = vector.load %arg1[%c0, %c0_0] : memref<256x128xf32, #tpu.memory_space<vmem>>, vector<256x128xf32>
    %c0_1 = arith.constant 0 : index
    %c0_2 = arith.constant 0 : index
    %1 = vector.load %arg2[%c0_1, %c0_2] : memref<128x128xf32, #tpu.memory_space<vmem>>, vector<128x128xf32>
    %cst = arith.constant dense<0.000000e+00> : vector<256x128xf32>
    %2 = tpu.matmul %0, %1, %cst {dimension_numbers = #tpu.dot_dimension_numbers<[1], [0], [0], [1], [0, 0, 1, 1], [], []>} : vector<256x128xf32>, vector<128x128xf32>, vector<256x128xf32> -> vector<256x128xf32>
    %c0_3 = arith.constant 0 : index
    %c0_4 = arith.constant 0 : index
    %3 = vector.load %arg3[%c0_3, %c0_4] : memref<256x128xf32, #tpu.memory_space<vmem>>, vector<256x128xf32>
    tpu.vector_store %arg3[%c0_3, %c0_4], %2 {strides = array<i32>} : memref<256x128xf32, #tpu.memory_space<vmem>>, vector<256x128xf32>,
    %c0_i32 = arith.constant 0 : i32
    %4 = arith.cmpi eq, %arg0, %c0_i32 : i32
    %5 = arith.extui %4 : i1 to i32
    %c0_i32_5 = arith.constant 0 : i32
    %6 = arith.cmpi ne, %5, %c0_i32_5 : i32
    scf.if %6 {
      %cst_15 = arith.constant 0.000000e+00 : f32
      %18 = vector.broadcast %cst_15 : f32 to vector<2x128xf32>
      %c0_16 = arith.constant 0 : index
      %c0_17 = arith.constant 0 : index
      %19 = vector.load %arg4[%c0_16, %c0_17] : memref<2x128xf32, #tpu.memory_space<vmem>>, vector<2x128xf32>
      tpu.vector_store %arg4[%c0_16, %c0_17], %18 {strides = array<i32>} : memref<2x128xf32, #tpu.memory_space<vmem>>, vector<2x128xf32>,
    } else {
    }
    %c0_6 = arith.constant 0 : index
    %c0_7 = arith.constant 0 : index
    %7 = vector.load %arg4[%c0_6, %c0_7] : memref<2x128xf32, #tpu.memory_space<vmem>>, vector<1x128xf32>
    %cst_8 = arith.constant dense<0.000000e+00> : vector<128xf32>
    %8 = vector.multi_reduction <add>, %2, %cst_8 [0] : vector<256x128xf32> to vector<128xf32>
    %9 = vector.shape_cast %8 : vector<128xf32> to vector<1x128xf32>
    %10 = arith.addf %7, %9 : vector<1x128xf32>
    %c0_9 = arith.constant 0 : index
    %c0_10 = arith.constant 0 : index
    %11 = vector.load %arg4[%c0_9, %c0_10] : memref<2x128xf32, #tpu.memory_space<vmem>>, vector<1x128xf32>
    tpu.vector_store %arg4[%c0_9, %c0_10], %10 {strides = array<i32>} : memref<2x128xf32, #tpu.memory_space<vmem>>, vector<1x128xf32>,
    %c1 = arith.constant 1 : index
    %c0_11 = arith.constant 0 : index
    %12 = vector.load %arg4[%c1, %c0_11] : memref<2x128xf32, #tpu.memory_space<vmem>>, vector<1x128xf32>
    %13 = arith.mulf %2, %2 : vector<256x128xf32>
    %cst_12 = arith.constant dense<0.000000e+00> : vector<128xf32>
    %14 = vector.multi_reduction <add>, %13, %cst_12 [0] : vector<256x128xf32> to vector<128xf32>
    %15 = vector.shape_cast %14 : vector<128xf32> to vector<1x128xf32>
    %16 = arith.addf %12, %15 : vector<1x128xf32>
    %c1_13 = arith.constant 1 : index
    %c0_14 = arith.constant 0 : index
    %17 = vector.load %arg4[%c1_13, %c0_14] : memref<2x128xf32, #tpu.memory_space<vmem>>, vector<1x128xf32>
    tpu.vector_store %arg4[%c1_13, %c0_14], %16 {strides = array<i32>} : memref<2x128xf32, #tpu.memory_space<vmem>>, vector<1x128xf32>,
    return
  }
  func.func @transform_0(%arg0: i32) -> (i32, i32) {
    %c0_i32 = arith.constant 0 : i32
    %c0_i32_0 = arith.constant 0 : i32
    return %arg0, %c0_i32 : i32, i32
  }
  func.func @transform_1(%arg0: i32) -> (i32, i32) {
    %c0_i32 = arith.constant 0 : i32
    %c0_i32_0 = arith.constant 0 : i32
    %c0_i32_1 = arith.constant 0 : i32
    return %c0_i32, %c0_i32_0 : i32, i32
  }
  func.func @transform_2(%arg0: i32) -> (i32, i32) {
    %c0_i32 = arith.constant 0 : i32
    %c0_i32_0 = arith.constant 0 : i32
    return %arg0, %c0_i32 : i32, i32
  }
  func.func @transform_3(%arg0: i32) -> (i32, i32) {
    %c0_i32 = arith.constant 0 : i32
    %c0_i32_0 = arith.constant 0 : i32
    %c0_i32_1 = arith.constant 0 : i32
    return %c0_i32, %c0_i32_0 : i32, i32
  }
}

</mosaic_0001>

<bundles_post_ra>
// kernel: tpu_custom_call.1
= control target key start
LH: loop header
LB: loop body
LE: loop exit
PB: predicated region body
PF: predicated region fallthrough
CT: control target
= control target key end

     0   :  { %9 = vsyncpa [#allocation3], 0  ;;  %s1639_s0 = inlined_call_operand.hbm [shape: f32[512,128], index: 0, kind: input, shape index: {}]   ;;  %s1640_s1 = inlined_call_operand.hbm [shape: f32[128,128], index: 1, kind: input, shape index: {}]   ;;  %s1641_s2 = inlined_call_operand.hbm [shape: f32[512,128], index: 2, kind: output, shape index: {0}]   ;;  %s1642_s3 = inlined_call_operand.hbm [shape: f32[2,128], index: 3, kind: output, shape index: {1}]  }
   0x1   :  { %11 = vsyncpa [#allocation3 + $0x1], 0 }
   0x2   :  { %12 = vsyncpa [#allocation6], 0 }
   0x3   :  { %13 = vsyncpa [#allocation4], 0 }
   0x4   :  { %15 = vsyncpa [#allocation4 + $0x1], 0 }
   0x5   :  { %16 = vsyncpa [#allocation9], 0  ;;  %s1177_s12 = smov 0   ;;  %s1179_s13 = smov 0  }
   0x6   :  { %s1181_s14 = smov 0   ;;  %s1183_s15 = smov 0  }
   0x7 LB: > { %s1198_s16 = sadd.s32 4294967295, %s1146_s15   ;;  %s746_s17 = sadd.s32 4294967294, %s1146_s15   ;;  %s1146_s15 = sphi %s1183_s15, %s1669_s15   ;;  %s1142_s14 = sphi %s1181_s14, %s1668_s14   ;;  %s1138_s13 = sphi %s1179_s13, %s1667_s13   ;;  %s1134_s12 = sphi %s1177_s12, %s1666_s12  }
   0x8   : > { %p42_p0 = scmp.ne.s32.totalorder %s1138_s13, %s1134_s12  ;;  %p1643_p1 = scmp.eq.s32.totalorder %s1198_s16, 0 }
   0x9   : > { %p93_p3 = scmp.eq.s32.totalorder %s746_s17, 1  ;;  %p747_p5 = scmp.ge.s32.totalorder %s1146_s15, 1 }
   0xa   : > { %p1207_p4 = por %p1643_p1, %p42_p0  ;;  %p121_p7 = scmp.lt.s32.totalorder %s1146_s15, 3 }
   0xb   : > { %p1212_p6 = por %p93_p3, %p42_p0  ;;  %s1148_s21 = smov [#allocation5]  }
   0xc   : > { %s1647_s18 = scalar_select %p1207_p4, 1, 0 }
   0xd   : > { %s1648_s19 = scalar_select %p1212_p6, 1, 0 }
   0xe   : > { %p1218_p9 = pnand %p747_p5, %p121_p7  ;;  %s133_s22 = sshll.u32 %s1148_s21, 4  ;;  %s134_s22 = int_to_ptr.vmem [resolvable:$true] %s133_s22 }
   0xf   : > { %s1232_s24 = sadd.s32 1, %s1146_s15   ;;  %s29_s25 = sadd.s32 1, %s1142_s14 }
  0x10   : > { %s1649_s20 = scalar_select %p1218_p9, 1, 0 }
  0x11   : > { %p939_p10 = pneg %p1218_p9  ;;  %s26_s26 = ssub.s32 %s1146_s15, %s1232_s24 }
  0x12   : > { %s1007_s27 = scalar_lea.vmem %s134_s22, 2048  ;;  %p1015_p7 = scmp.lt.s32.totalorder %s134_s22, %s134_s22 }
  0x13   : > { %p1227_p12 = pnand %p939_p10, %p1643_p1  ;;  %p1008_p0 = scmp.ne.s32.totalorder %s134_s22, %s1007_s27 }
  0x14   : > { %p1016_p8 = scmp.lt.s32.totalorder %s1007_s27, %s1007_s27 }
  0x15   : > { %p998_p13 = pneg %p1227_p12 }
  0x16   : > { %p1017_p11 = por %p1016_p8, %p1015_p7 }
  0x17   : > { %p1010_p3 = pnand %p1008_p0, %p998_p13 }
  0x19   : > { %p1011_p5 = pneg %p1010_p3 }
  0x1b   : > { %p1018_p2 = pnand %p1017_p11, %p1011_p5 }
  0x1d   : > { %1021 = shalt.err (!%p1018_p2)
}
  0x1e   : > { %s1149_s28 = smov 128   ;;  %s1150_s29 = smov 8  }
  0x1f   : > { %942 = dma.hbm_to_vmem [thread:$0]  (!%p1227_p12), %s1640_s1, 2048, %s134_s22, [#allocation6], %s1149_s28, %s1149_s28, %s1150_s29  }
  0x20   : > { %p27_p2 = scmp.eq.s32.totalorder %s26_s26, 0  ;;  %p36_p8 = scmp.ne.s32.totalorder %s1142_s14, %s1138_s13 }
  0x21   : > { %p37_p10 = scmp.eq.s32.totalorder %s1146_s15, 0  ;;  %p952_p11 = scmp.lt.s32.totalorder %s1146_s15, 2 }
  0x22   : > { %s1252_s5 = scalar_select %p27_p2, %s1142_s14, %s29_s25  }
  0x23   : > { %p38_p13 = por %p37_p10, %p36_p8  ;;  %p1651_p0 = scmp.eq.s32.totalorder %s1198_s16, 1 }
  0x24   : > { %s147_s7 = sand.u32 1, %s1142_s14   ;;  %s765_s8 = sshll.u32 %s1146_s15, 12 }
  0x25   : > { %p1256_p3 = por %p1651_p0, %p36_p8  ;;  %s750_s9 = sshll.u32 %s147_s7, 8 }
  0x26   : > { %s1265_s17 = scalar_lea.hbm %s1639_s0, %s765_s8  ;;  %s151_s21 = scalar_lea.vmem [#allocation2], %s750_s9 }
  0x27   : > { %s1652_s6 = scalar_select %p1256_p3, 1, 0 }
  0x28   : > { %s158_s22 = sshll.u32 %s151_s21, 4  ;;  %p1267_p12 = pnand %p952_p11, %p38_p13  ;;  %s1271_s22 = int_to_ptr.vmem [resolvable:$true] %s158_s22 }
  0x29   : > { %s1273_s25 = scalar_lea.sflag [#allocation3], %s147_s7  ;;  %s1022_s26 = scalar_lea.hbm %s1265_s17, 4096 }
  0x2a   : > { %p1023_p5 = scmp.ne.s32.totalorder %s1265_s17, %s1022_s26  ;;  %p1024_p7 = pneg %p1267_p12 }
  0x2b   : > { %s1027_s4 = scalar_lea.hbm %s1639_s0, 8192  ;;  %p1028_p10 = scmp.lt.s32.totalorder %s1265_s17, %s1639_s0 }
  0x2c   : > { %p1025_p2 = pnand %p1024_p7, %p1023_p5  ;;  %p1029_p11 = scmp.lt.s32.totalorder %s1027_s4, %s1022_s26 }
  0x2e   : > { %p1026_p8 = pneg %p1025_p2  ;;  %p1030_p13 = por %p1029_p11, %p1028_p10 }
  0x30   : > { %p1031_p0 = pnand %p1030_p13, %p1026_p8 }
  0x32   : > { %1034 = shalt.err (!%p1031_p0)
}
  0x33   : > { %s1035_s7 = scalar_lea.vmem %s1271_s22, 4096  ;;  %s1151_s10 = smov [#allocation2]  }
  0x34   : > { %p1036_p1 = scmp.ne.s32.totalorder %s1271_s22, %s1035_s7  ;;  %s1040_s11 = sshll.u32 %s1151_s10, 4  ;;  %s1041_s11 = int_to_ptr.vmem [resolvable:$false] %s1040_s11 }
  0x35   : > { %s1042_s21 = scalar_lea.vmem %s1041_s11, 8192  ;;  %p1043_p2 = scmp.lt.s32.totalorder %s1271_s22, %s1041_s11 }
  0x36   : > { %p1038_p6 = pnand %p1036_p1, %p1024_p7  ;;  %p1044_p3 = scmp.lt.s32.totalorder %s1042_s21, %s1035_s7 }
  0x38   : > { %p1039_p5 = pneg %p1038_p6  ;;  %p1045_p4 = por %p1044_p3, %p1043_p2 }
  0x3a   : > { %p1046_p9 = pnand %p1045_p4, %p1039_p5 }
  0x3c   : > { %1049 = shalt.err (!%p1046_p9)
}
  0x3d   : > { %946 = dma.hbm_to_vmem [thread:$0]  (!%p1267_p12), %s1265_s17, 4096, %s1271_s22, %s1273_s25, %s1149_s28, %s1149_s28, %s1150_s29  }
  0x3e   : > { %p1654_p1 = scmp.ne.s32.totalorder %s1649_s20, 0 }
  0x3f   : > { %s1300_s26 = sand.u32 (!%p1654_p1), 1, %s1138_s13   ;;  %p1655_p4 = scmp.ne.s32.totalorder (!%p1654_p1), %s1647_s18, 0 }
  0x40   : > { %170 = sbr.rel (%p1654_p1) target bundleno = 443 (0x1bb), region = 28  ;;  %s754_s27 = sshll.u32 (!%p1654_p1), %s1300_s26, 8 }
  0x41   : > { %s173_s30 = scalar_lea.sflag (!%p1654_p1), [#allocation3], %s1300_s26  ;;  %s1306_s23 = scalar_lea.vmem (!%p1654_p1), [#allocation2], %s754_s27 }
  0x45   : > { %1117 = dma.done.wait (%p1655_p4), %s173_s30, 4096  }
  0x46   : > { %1119 = vsyncadd (%p1655_p4), %s173_s30, 4294963200  ;;  %p1656_p6 = scmp.eq.s32.totalorder %s1198_s16, 0 }
  0x48   : > { %1121 = dma.done.wait (%p1656_p6), [#allocation6], 2048   ;;  %p1657_p9 = pmov %p1656_p6 }
  0x49   : > { %v252_v0 = vld [vmem:[#allocation5 + $0x78] sm:$0xff]  ;;  %v251_v1 = vld [vmem:[#allocation5 + $0x70] sm:$0xff]  ;;  %v250_v2 = vld [vmem:[#allocation5 + $0x68] sm:$0xff]  ;;  %s1354_s18 = scalar_lea.vmem [#allocation7], %s754_s27  ;;  %p1658_p3 = scmp.ne.s32.totalorder %s1198_s16, 0 }
  0x4a   : > { %1123 = vsyncadd (%p1657_p9), [#allocation6], 4294965248  ;;  %815 = vmatprep.subr.mxu0 %v252_v0  ;;  %895 = vmatprep.subr.mxu1 %v252_v0  ;;  %v249_v3 = vld [vmem:[#allocation5 + $0x60] sm:$0xff]  ;;  %v248_v4 = vld [vmem:[#allocation5 + $0x58] sm:$0xff] }
  0x4b   : > { %816 = vmatpush3.msra.mxu0 %v252_v0  ;;  %911 = vmatpush3.msra.mxu1 %v252_v0  ;;  %v247_v5 = vld [vmem:[#allocation5 + $0x50] sm:$0xff]  ;;  %v246_v6 = vld [vmem:[#allocation5 + $0x48] sm:$0xff]  ;;  %v245_v7 = vld [vmem:[#allocation5 + $0x40] sm:$0xff] }
  0x4c   : > { %817 = vmatprep.subr.mxu0 %v251_v1  ;;  %896 = vmatprep.subr.mxu1 %v251_v1  ;;  %v244_v8 = vld [vmem:[#allocation5 + $0x38] sm:$0xff]  ;;  %v243_v9 = vld [vmem:[#allocation5 + $0x30] sm:$0xff]  ;;  %v242_v10 = vld [vmem:[#allocation5 + $0x28] sm:$0xff] }
  0x4d   : > { %818 = vmatpush3.msra.mxu0 %v251_v1  ;;  %912 = vmatpush3.msra.mxu1 %v251_v1  ;;  %v241_v11 = vld [vmem:[#allocation5 + $0x20] sm:$0xff]  ;;  %v240_v12 = vld [vmem:[#allocation5 + $0x18] sm:$0xff]  ;;  %v239_v13 = vld [vmem:[#allocation5 + $0x10] sm:$0xff] }
  0x4e   : > { %819 = vmatprep.subr.mxu0 %v250_v2  ;;  %897 = vmatprep.subr.mxu1 %v250_v2  ;;  %v238_v14 = vld [vmem:[#allocation5 + $0x8] sm:$0xff]  ;;  %v237_v15 = vld [vmem:[#allocation5] sm:$0xff]  ;;  %v207_v20 = vld [vmem:[%s1306_s23 + $0x10] sm:$0xff] }
  0x4f   : > { %820 = vmatpush3.msra.mxu0 %v250_v2  ;;  %913 = vmatpush3.msra.mxu1 %v250_v2  ;;  %v205_v16 = vld [vmem:[%s1306_s23] sm:$0xff]  ;;  %v206_v18 = vld [vmem:[%s1306_s23 + $0x8] sm:$0xff]  ;;  %v223_v21 = vld [vmem:[%s1306_s23 + $0x90] sm:$0xff] }
  0x50   : > { %821 = vmatprep.subr.mxu0 %v249_v3  ;;  %898 = vmatprep.subr.mxu1 %v249_v3  ;;  %v221_v17 = vld [vmem:[%s1306_s23 + $0x80] sm:$0xff]  ;;  %v222_v19 = vld [vmem:[%s1306_s23 + $0x88] sm:$0xff]  ;;  %v208_v22 = vld [vmem:[%s1306_s23 + $0x18] sm:$0xff] }
  0x51   : > { %822 = vmatpush3.msra.mxu0 %v249_v3  ;;  %914 = vmatpush3.msra.mxu1 %v249_v3  ;;  %v224_v23 = vld [vmem:[%s1306_s23 + $0x98] sm:$0xff]  ;;  %v209_v24 = vld [vmem:[%s1306_s23 + $0x20] sm:$0xff]  ;;  %v210_v26 = vld [vmem:[%s1306_s23 + $0x28] sm:$0xff] }
  0x52   : > { %823 = vmatprep.subr.mxu0 %v248_v4  ;;  %899 = vmatprep.subr.mxu1 %v248_v4  ;;  %v225_v25 = vld [vmem:[%s1306_s23 + $0xa0] sm:$0xff]  ;;  %v226_v27 = vld [vmem:[%s1306_s23 + $0xa8] sm:$0xff]  ;;  %v211_v28 = vld [vmem:[%s1306_s23 + $0x30] sm:$0xff] }
  0x53   : > { %824 = vmatpush3.msra.mxu0 %v248_v4  ;;  %915 = vmatpush3.msra.mxu1 %v248_v4  ;;  %v227_v29 = vld [vmem:[%s1306_s23 + $0xb0] sm:$0xff]  ;;  %v212_v30 = vld [vmem:[%s1306_s23 + $0x38] sm:$0xff]  ;;  %v213_v32 = vld [vmem:[%s1306_s23 + $0x40] sm:$0xff] }
  0x54   : > { %825 = vmatprep.subr.mxu0 %v247_v5  ;;  %900 = vmatprep.subr.mxu1 %v247_v5  ;;  %v228_v31 = vld [vmem:[%s1306_s23 + $0xb8] sm:$0xff]  ;;  %v229_v33 = vld [vmem:[%s1306_s23 + $0xc0] sm:$0xff]  ;;  %v214_v34 = vld [vmem:[%s1306_s23 + $0x48] sm:$0xff] }
  0x55   : > { %826 = vmatpush3.msra.mxu0 %v247_v5  ;;  %916 = vmatpush3.msra.mxu1 %v247_v5  ;;  %v230_v35 = vld [vmem:[%s1306_s23 + $0xc8] sm:$0xff]  ;;  %v215_v36 = vld [vmem:[%s1306_s23 + $0x50] sm:$0xff]  ;;  %v216_v38 = vld [vmem:[%s1306_s23 + $0x58] sm:$0xff] }
  0x56   : > { %827 = vmatprep.subr.mxu0 %v246_v6  ;;  %901 = vmatprep.subr.mxu1 %v246_v6  ;;  %v231_v37 = vld [vmem:[%s1306_s23 + $0xd0] sm:$0xff]  ;;  %v232_v39 = vld [vmem:[%s1306_s23 + $0xd8] sm:$0xff]  ;;  %v217_v40 = vld [vmem:[%s1306_s23 + $0x60] sm:$0xff] }
  0x57   : > { %828 = vmatpush3.msra.mxu0 %v246_v6  ;;  %917 = vmatpush3.msra.mxu1 %v246_v6  ;;  %v233_v41 = vld [vmem:[%s1306_s23 + $0xe0] sm:$0xff]  ;;  %v218_v42 = vld [vmem:[%s1306_s23 + $0x68] sm:$0xff]  ;;  %v219_v44 = vld [vmem:[%s1306_s23 + $0x70] sm:$0xff] }
  0x58   : > { %829 = vmatprep.subr.mxu0 %v245_v7  ;;  %902 = vmatprep.subr.mxu1 %v245_v7  ;;  %v234_v43 = vld [vmem:[%s1306_s23 + $0xe8] sm:$0xff]  ;;  %v235_v45 = vld [vmem:[%s1306_s23 + $0xf0] sm:$0xff]  ;;  %v220_v46 = vld [vmem:[%s1306_s23 + $0x78] sm:$0xff] }
  0x59   : > { %830 = vmatpush3.msra.mxu0 %v245_v7  ;;  %918 = vmatpush3.msra.mxu1 %v245_v7  ;;  %v236_v47 = vld [vmem:[%s1306_s23 + $0xf8] sm:$0xff] }
  0x5a   : > { %831 = vmatprep.subr.mxu0 %v244_v8  ;;  %903 = vmatprep.subr.mxu1 %v244_v8 }
  0x5b   : > { %832 = vmatpush3.msra.mxu0 %v244_v8  ;;  %919 = vmatpush3.msra.mxu1 %v244_v8 }
  0x5c   : > { %833 = vmatprep.subr.mxu0 %v243_v9  ;;  %904 = vmatprep.subr.mxu1 %v243_v9 }
  0x5d   : > { %834 = vmatpush3.msra.mxu0 %v243_v9  ;;  %920 = vmatpush3.msra.mxu1 %v243_v9 }
  0x5e   : > { %835 = vmatprep.subr.mxu0 %v242_v10  ;;  %905 = vmatprep.subr.mxu1 %v242_v10 }
  0x5f   : > { %836 = vmatpush3.msra.mxu0 %v242_v10  ;;  %921 = vmatpush3.msra.mxu1 %v242_v10 }
  0x60   : > { %837 = vmatprep.subr.mxu0 %v241_v11  ;;  %906 = vmatprep.subr.mxu1 %v241_v11 }
  0x61   : > { %838 = vmatpush3.msra.mxu0 %v241_v11  ;;  %922 = vmatpush3.msra.mxu1 %v241_v11 }
  0x62   : > { %839 = vmatprep.subr.mxu0 %v240_v12  ;;  %907 = vmatprep.subr.mxu1 %v240_v12 }
  0x63   : > { %840 = vmatpush3.msra.mxu0 %v240_v12  ;;  %923 = vmatpush3.msra.mxu1 %v240_v12 }
  0x64   : > { %841 = vmatprep.subr.mxu0 %v239_v13  ;;  %908 = vmatprep.subr.mxu1 %v239_v13 }
  0x65   : > { %842 = vmatpush3.msra.mxu0 %v239_v13  ;;  %924 = vmatpush3.msra.mxu1 %v239_v13 }
  0x66   : > { %843 = vmatprep.subr.mxu0 %v238_v14  ;;  %909 = vmatprep.subr.mxu1 %v238_v14 }
  0x67   : > { %844 = vmatpush3.msra.mxu0 %v238_v14  ;;  %925 = vmatpush3.msra.mxu1 %v238_v14 }
  0x68   : > { %845 = vmatprep.subr.mxu0 %v237_v15  ;;  %910 = vmatprep.subr.mxu1 %v237_v15 }
  0x69   : > { %846 = vmatpush3.msra.mxu0 %v237_v15  ;;  %926 = vmatpush3.msra.mxu1 %v237_v15 }
  0x6a   : > { %847 = vmatprep.mubr.f32.mxu0 %v205_v16  ;;  %871 = vmatprep.mubr.f32.mxu1 %v221_v17 }
  0x6b   : > { %848 = vmatmul.mubr.f32.vlgmr.msra.gmra.mxu0 %v206_v18  ;;  %872 = vmatmul.mubr.f32.vlgmr.msra.gmra.mxu1 %v222_v19 }
  0x6c   : > { %850 = vmatprep.mubr.f32.mxu0 %v207_v20  ;;  %874 = vmatprep.mubr.f32.mxu1 %v223_v21 }
  0x6f   : > { %851 = vmatmul.mubr.f32.gmra.mxu0 %v208_v22  ;;  %875 = vmatmul.mubr.f32.gmra.mxu1 %v224_v23 }
  0x70   : > { %853 = vmatprep.mubr.f32.mxu0 %v209_v24  ;;  %877 = vmatprep.mubr.f32.mxu1 %v225_v25 }
  0x73   : > { %854 = vmatmul.mubr.f32.gmra.mxu0 %v210_v26  ;;  %878 = vmatmul.mubr.f32.gmra.mxu1 %v226_v27 }
  0x74   : > { %856 = vmatprep.mubr.f32.mxu0 %v211_v28  ;;  %880 = vmatprep.mubr.f32.mxu1 %v227_v29 }
  0x77   : > { %857 = vmatmul.mubr.f32.gmra.mxu0 %v212_v30  ;;  %881 = vmatmul.mubr.f32.gmra.mxu1 %v228_v31 }
  0x78   : > { %859 = vmatprep.mubr.f32.mxu0 %v213_v32  ;;  %883 = vmatprep.mubr.f32.mxu1 %v229_v33 }
  0x7b   : > { %860 = vmatmul.mubr.f32.gmra.mxu0 %v214_v34  ;;  %884 = vmatmul.mubr.f32.gmra.mxu1 %v230_v35 }
  0x7c   : > { %862 = vmatprep.mubr.f32.mxu0 %v215_v36  ;;  %886 = vmatprep.mubr.f32.mxu1 %v231_v37 }
  0x7f   : > { %863 = vmatmul.mubr.f32.gmra.mxu0 %v216_v38  ;;  %887 = vmatmul.mubr.f32.gmra.mxu1 %v232_v39 }
  0x80   : > { %865 = vmatprep.mubr.f32.mxu0 %v217_v40  ;;  %889 = vmatprep.mubr.f32.mxu1 %v233_v41 }
  0x83   : > { %866 = vmatmul.mubr.f32.gmra.mxu0 %v218_v42  ;;  %890 = vmatmul.mubr.f32.gmra.mxu1 %v234_v43 }
  0x84   : > { %868 = vmatprep.mubr.f32.mxu0 %v219_v44  ;;  %892 = vmatprep.mubr.f32.mxu1 %v235_v45 }
  0x87   : > { %869 = vmatmul.mubr.f32.gmra.mxu0 %v220_v46  ;;  %893 = vmatmul.mubr.f32.gmra.mxu1 %v236_v47 }
 0x12b   : > { %v1348_v48 = vpop.f32.mrf.mxu0  ;;  %v1350_v49 = vpop.f32.mrf.mxu1 }
 0x12c   : > { %479 = vst [vmem:[%s1354_s18 + $0x8] sm:$0xff] %v1348_v48  ;;  %495 = vst [vmem:[%s1354_s18 + $0x88] sm:$0xff] %v1350_v49 }
 0x12d   : > { %v1360_v50 = vpop.f32.mrf.mxu0  ;;  %v1362_v51 = vpop.f32.mrf.mxu1 }
 0x12e   : > { %478 = vst [vmem:[%s1354_s18] sm:$0xff] %v1360_v50  ;;  %494 = vst [vmem:[%s1354_s18 + $0x80] sm:$0xff] %v1362_v51 }
 0x12f   : > { %v1368_v52 = vpop.f32.mrf.mxu0  ;;  %v1370_v53 = vpop.f32.mrf.mxu1 }
 0x130   : > { %481 = vst [vmem:[%s1354_s18 + $0x18] sm:$0xff] %v1368_v52  ;;  %497 = vst [vmem:[%s1354_s18 + $0x98] sm:$0xff] %v1370_v53 }
 0x131   : > { %v1376_v54 = vpop.f32.mrf.mxu0  ;;  %v1378_v55 = vpop.f32.mrf.mxu1 }
 0x132   : > { %480 = vst [vmem:[%s1354_s18 + $0x10] sm:$0xff] %v1376_v54  ;;  %496 = vst [vmem:[%s1354_s18 + $0x90] sm:$0xff] %v1378_v55 }
 0x133   : > { %v1384_v56 = vpop.f32.mrf.mxu0  ;;  %v1386_v57 = vpop.f32.mrf.mxu1 }
 0x134   : > { %483 = vst [vmem:[%s1354_s18 + $0x28] sm:$0xff] %v1384_v56  ;;  %499 = vst [vmem:[%s1354_s18 + $0xa8] sm:$0xff] %v1386_v57 }
 0x135   : > { %v1392_v58 = vpop.f32.mrf.mxu0  ;;  %v1394_v59 = vpop.f32.mrf.mxu1 }
 0x136   : > { %482 = vst [vmem:[%s1354_s18 + $0x20] sm:$0xff] %v1392_v58  ;;  %498 = vst [vmem:[%s1354_s18 + $0xa0] sm:$0xff] %v1394_v59 }
 0x137   : > { %v1400_v60 = vpop.f32.mrf.mxu0  ;;  %v1402_v61 = vpop.f32.mrf.mxu1 }
 0x138   : > { %485 = vst [vmem:[%s1354_s18 + $0x38] sm:$0xff] %v1400_v60  ;;  %501 = vst [vmem:[%s1354_s18 + $0xb8] sm:$0xff] %v1402_v61 }
 0x139   : > { %v1408_v62 = vpop.f32.mrf.mxu0  ;;  %v1410_v63 = vpop.f32.mrf.mxu1 }
 0x13a   : > { %484 = vst [vmem:[%s1354_s18 + $0x30] sm:$0xff] %v1408_v62  ;;  %500 = vst [vmem:[%s1354_s18 + $0xb0] sm:$0xff] %v1410_v63 }
 0x13b   : > { %v1416_v0 = vpop.f32.mrf.mxu0  ;;  %v1418_v1 = vpop.f32.mrf.mxu1 }
 0x13c   : > { %487 = vst [vmem:[%s1354_s18 + $0x48] sm:$0xff] %v1416_v0  ;;  %503 = vst [vmem:[%s1354_s18 + $0xc8] sm:$0xff] %v1418_v1 }
 0x13d   : > { %v1424_v2 = vpop.f32.mrf.mxu0  ;;  %v1426_v3 = vpop.f32.mrf.mxu1 }
 0x13e   : > { %486 = vst [vmem:[%s1354_s18 + $0x40] sm:$0xff] %v1424_v2  ;;  %502 = vst [vmem:[%s1354_s18 + $0xc0] sm:$0xff] %v1426_v3 }
 0x13f   : > { %v1432_v4 = vpop.f32.mrf.mxu0  ;;  %v1434_v5 = vpop.f32.mrf.mxu1 }
 0x140   : > { %489 = vst [vmem:[%s1354_s18 + $0x58] sm:$0xff] %v1432_v4  ;;  %505 = vst [vmem:[%s1354_s18 + $0xd8] sm:$0xff] %v1434_v5 }
 0x141   : > { %v1440_v6 = vpop.f32.mrf.mxu0  ;;  %v1442_v7 = vpop.f32.mrf.mxu1 }
 0x142   : > { %488 = vst [vmem:[%s1354_s18 + $0x50] sm:$0xff] %v1440_v6  ;;  %504 = vst [vmem:[%s1354_s18 + $0xd0] sm:$0xff] %v1442_v7 }
 0x143   : > { %v1448_v8 = vpop.f32.mrf.mxu0  ;;  %v1450_v9 = vpop.f32.mrf.mxu1 }
 0x144   : > { %491 = vst [vmem:[%s1354_s18 + $0x68] sm:$0xff] %v1448_v8  ;;  %507 = vst [vmem:[%s1354_s18 + $0xe8] sm:$0xff] %v1450_v9 }
 0x145   : > { %v1456_v10 = vpop.f32.mrf.mxu0  ;;  %v1458_v11 = vpop.f32.mrf.mxu1 }
 0x146   : > { %490 = vst [vmem:[%s1354_s18 + $0x60] sm:$0xff] %v1456_v10  ;;  %506 = vst [vmem:[%s1354_s18 + $0xe0] sm:$0xff] %v1458_v11  ;;  %513 = sbr.rel (%p1658_p3) target bundleno = 333 (0x14d), region = 40 }
 0x147   : > { %v1464_v12 = vpop.f32.mrf.mxu0  ;;  %v1466_v13 = vpop.f32.mrf.mxu1 }
 0x148   : > { %493 = vst [vmem:[%s1354_s18 + $0x78] sm:$0xff] %v1464_v12  ;;  %509 = vst [vmem:[%s1354_s18 + $0xf8] sm:$0xff] %v1466_v13 }
 0x149   : > { %v1472_v14 = vpop.f32.mrf.mxu0  ;;  %v1474_v15 = vpop.f32.mrf.mxu1 }
 0x14a   : > { %492 = vst [vmem:[%s1354_s18 + $0x70] sm:$0xff] %v1472_v14  ;;  %508 = vst [vmem:[%s1354_s18 + $0xf0] sm:$0xff] %v1474_v15 }
 0x14b   : > { %v1152_v16 = vmov 0.0  }
 0x14c   : > { %514 = vst [vmem:[#allocation8] sm:$0x3] %v1152_v16 }
 0x14d PF: > { %v516_v17 = vadd.f32 %v1348_v48, %v1360_v50  ;;  %s766_s20 = sshll.u32 %s1198_s16, 12  ;;  %s641_s22 = sshll.u32 %s1354_s18, 4  ;;  %s1492_s22 = int_to_ptr.vmem [resolvable:$true] %s641_s22 }
 0x14e   : > { %s1488_s17 = scalar_lea.hbm %s1641_s2, %s766_s20  ;;  %s628_s25 = scalar_lea.sflag [#allocation4], %s1300_s26 }
 0x14f   : > { %v517_v18 = vadd.f32 %v516_v17, %v1376_v54  ;;  %s1050_s4 = scalar_lea.vmem %s1492_s22, 4096  ;;  %p1659_p7 = scmp.ne.s32.totalorder %s1652_s6, 0 }
 0x150   : > { %p1051_p12 = scmp.ne.s32.totalorder %s1492_s22, %s1050_s4  ;;  %s1153_s8 = smov [#allocation7]  }
 0x151   : > { %v518_v19 = vadd.f32 %v1368_v52, %v517_v18  ;;  %s1054_s9 = sshll.u32 %s1153_s8, 4  ;;  %s1055_s9 = int_to_ptr.vmem [resolvable:$false] %s1054_s9 }
 0x152   : > { %p1052_p8 = pnand %p1051_p12, %p1659_p7  ;;  %s1056_s7 = scalar_lea.vmem %s1055_s9, 8192 }
 0x153   : > { %p1057_p11 = scmp.lt.s32.totalorder %s1492_s22, %s1055_s9  ;;  %p1058_p13 = scmp.lt.s32.totalorder %s1056_s7, %s1050_s4 }
 0x154   : > { %p1053_p10 = pneg %p1052_p8 }
 0x155   : > { %p1059_p0 = por %p1058_p13, %p1057_p11 }
 0x157   : > { %p1060_p5 = pnand %p1059_p0, %p1053_p10 }
 0x159   : > { %1063 = shalt.err (!%p1060_p5)
}
 0x15a   : > { %s1064_s10 = scalar_lea.hbm %s1488_s17, 4096  ;;  %s1068_s27 = scalar_lea.hbm %s1641_s2, 8192 }
 0x15b   : > { %p1065_p2 = scmp.ne.s32.totalorder %s1488_s17, %s1064_s10  ;;  %p1069_p6 = scmp.lt.s32.totalorder %s1488_s17, %s1641_s2 }
 0x15c   : > { %p1070_p9 = scmp.lt.s32.totalorder %s1068_s27, %s1064_s10 }
 0x15d   : > { %p1066_p1 = pnand %p1065_p2, %p1659_p7 }
 0x15e   : > { %p1071_p3 = por %p1070_p9, %p1069_p6 }
 0x15f   : > { %p1067_p4 = pneg %p1066_p1 }
 0x161   : > { %p1072_p12 = pnand %p1071_p3, %p1067_p4 }
 0x163   : > { %1075 = shalt.err (!%p1072_p12)
}
 0x164   : > { %s1154_s18 = smov 128   ;;  %s1155_s20 = smov 8   ;;  %v556_v20 = vmul.f32 %v1360_v50, %v1360_v50  ;;  %v557_v21 = vmul.f32 %v1348_v48, %v1348_v48  ;;  %v519_v22 = vadd.f32 %v518_v19, %v1392_v58  ;;  %v558_v23 = vmul.f32 %v1376_v54, %v1376_v54 }
 0x165   : > { %933 = dma.vmem_to_hbm [thread:$0]  (%p1659_p7), %s1492_s22, 4096, %s1488_s17, %s628_s25, %s1154_s18, %s1154_s18, %s1155_s20   ;;  %v559_v25 = vmul.f32 %v1368_v52, %v1368_v52  ;;  %v560_v28 = vmul.f32 %v1392_v58, %v1392_v58  ;;  %v561_v31 = vmul.f32 %v1384_v56, %v1384_v56  ;;  %v562_v34 = vmul.f32 %v1408_v62, %v1408_v62 }
 0x166   : > { %v520_v24 = vadd.f32 %v1384_v56, %v519_v22  ;;  %v588_v26 = vadd.f32 %v557_v21, %v556_v20  ;;  %v563_v37 = vmul.f32 %v1400_v60, %v1400_v60  ;;  %v564_v40 = vmul.f32 %v1424_v2, %v1424_v2  ;;  %s1156_s6 = smov [#allocation8]   ;;  %p1660_p8 = scmp.eq.s32.totalorder %s1198_s16, 1 }
 0x167   : > { %v565_v43 = vmul.f32 %v1416_v0, %v1416_v0  ;;  %v566_v46 = vmul.f32 %v1440_v6, %v1440_v6  ;;  %v567_v50 = vmul.f32 %v1432_v4, %v1432_v4  ;;  %v568_v56 = vmul.f32 %v1456_v10, %v1456_v10  ;;  %s655_s26 = sshll.u32 %s1156_s6, 4  ;;  %s656_s26 = int_to_ptr.vmem [resolvable:$true] %s655_s26 }
 0x168   : > { %v521_v27 = vadd.f32 %v520_v24, %v1408_v62  ;;  %v589_v29 = vadd.f32 %v588_v26, %v558_v23  ;;  %v569_v62 = vmul.f32 %v1448_v8, %v1448_v8  ;;  %v571_v17 = vmul.f32 %v1464_v12, %v1464_v12  ;;  %s1076_s28 = scalar_lea.vmem %s656_s26, 32  ;;  %p1083_p13 = scmp.lt.s32.totalorder %s656_s26, %s656_s26 }
 0x169   : > { %v572_v19 = vmul.f32 %v1362_v51, %v1362_v51  ;;  %v573_v21 = vmul.f32 %v1350_v49, %v1350_v49  ;;  %v574_v23 = vmul.f32 %v1378_v55, %v1378_v55  ;;  %p1077_p7 = scmp.ne.s32.totalorder %s656_s26, %s1076_s28  ;;  %p1084_p0 = scmp.lt.s32.totalorder %s1076_s28, %s1076_s28 }
 0x16a   : > { %v522_v30 = vadd.f32 %v1400_v60, %v521_v27  ;;  %v590_v32 = vadd.f32 %v589_v29, %v559_v25  ;;  %v575_v25 = vmul.f32 %v1370_v53, %v1370_v53  ;;  %v576_v27 = vmul.f32 %v1394_v59, %v1394_v59 }
 0x16b   : > { %v577_v29 = vmul.f32 %v1386_v57, %v1386_v57  ;;  %p1078_p10 = pnand %p1077_p7, %p1660_p8  ;;  %p1085_p5 = por %p1084_p0, %p1083_p13 }
 0x16c   : > { %v523_v33 = vadd.f32 %v522_v30, %v1424_v2  ;;  %v591_v35 = vadd.f32 %v590_v32, %v560_v28 }
 0x16d   : > { %p1079_p11 = pneg %p1078_p10 }
 0x16e   : > { %v524_v36 = vadd.f32 %v1416_v0, %v523_v33  ;;  %v592_v38 = vadd.f32 %v591_v35, %v561_v31  ;;  %v578_v31 = vmul.f32 %v1410_v63, %v1410_v63  ;;  %v579_v33 = vmul.f32 %v1402_v61, %v1402_v61 }
 0x16f   : > { %v580_v35 = vmul.f32 %v1426_v3, %v1426_v3  ;;  %p1086_p2 = pnand %p1085_p5, %p1079_p11 }
 0x170   : > { %v525_v39 = vadd.f32 %v524_v36, %v1440_v6  ;;  %v593_v41 = vadd.f32 %v592_v38, %v562_v34  ;;  %v570_v6 = vmul.f32 %v1472_v14, %v1472_v14 }
 0x172   : > { %v526_v42 = vadd.f32 %v1432_v4, %v525_v39  ;;  %v594_v44 = vadd.f32 %v593_v41, %v563_v37  ;;  %v581_v37 = vmul.f32 %v1418_v1, %v1418_v1  ;;  %v582_v39 = vmul.f32 %v1442_v7, %v1442_v7 }
 0x173   : > { %v583_v41 = vmul.f32 %v1434_v5, %v1434_v5 }
 0x174   : > { %v527_v45 = vadd.f32 %v526_v42, %v1456_v10  ;;  %v595_v47 = vadd.f32 %v594_v44, %v564_v40 }
 0x176   : > { %v528_v48 = vadd.f32 %v1448_v8, %v527_v45  ;;  %v596_v52 = vadd.f32 %v595_v47, %v565_v43  ;;  %v584_v43 = vmul.f32 %v1458_v11, %v1458_v11  ;;  %v585_v45 = vmul.f32 %v1450_v9, %v1450_v9 }
 0x177   : > { %v586_v47 = vmul.f32 %v1474_v15, %v1474_v15 }
 0x178   : > { %v529_v54 = vadd.f32 %v528_v48, %v1472_v14  ;;  %v597_v58 = vadd.f32 %v596_v52, %v566_v46 }
 0x17a   : > { %v530_v60 = vadd.f32 %v1464_v12, %v529_v54  ;;  %v598_v0 = vadd.f32 %v597_v58, %v567_v50 }
 0x17c   : > { %v531_v2 = vadd.f32 %v530_v60, %v1362_v51  ;;  %v599_v16 = vadd.f32 %v598_v0, %v568_v56 }
 0x17e   : > { %v532_v4 = vadd.f32 %v1350_v49, %v531_v2  ;;  %v600_v18 = vadd.f32 %v599_v16, %v569_v62  ;;  %v515_v62 = vld [vmem:[#allocation8] sm:$0x1] }
 0x180   : > { %v533_v10 = vadd.f32 %v532_v4, %v1378_v55  ;;  %v601_v20 = vadd.f32 %v600_v18, %v570_v6 }
 0x182   : > { %v534_v8 = vadd.f32 %v1370_v53, %v533_v10  ;;  %v602_v22 = vadd.f32 %v601_v20, %v571_v17  ;;  %v555_v17 = vld [vmem:[#allocation8 + $0x1] sm:$0x1] }
 0x184   : > { %v535_v14 = vadd.f32 %v534_v8, %v1394_v59  ;;  %v603_v24 = vadd.f32 %v602_v22, %v572_v19 }
 0x186   : > { %v536_v12 = vadd.f32 %v1386_v57, %v535_v14  ;;  %v604_v26 = vadd.f32 %v603_v24, %v573_v21 }
 0x188   : > { %v537_v51 = vadd.f32 %v536_v12, %v1410_v63  ;;  %v605_v28 = vadd.f32 %v604_v26, %v574_v23 }
 0x18a   : > { %v538_v49 = vadd.f32 %v1402_v61, %v537_v51  ;;  %v606_v30 = vadd.f32 %v605_v28, %v575_v25 }
 0x18c   : > { %v539_v55 = vadd.f32 %v538_v49, %v1426_v3  ;;  %v607_v32 = vadd.f32 %v606_v30, %v576_v27 }
 0x18e   : > { %v540_v53 = vadd.f32 %v1418_v1, %v539_v55  ;;  %v608_v34 = vadd.f32 %v607_v32, %v577_v29 }
 0x190   : > { %v541_v59 = vadd.f32 %v540_v53, %v1442_v7  ;;  %v609_v36 = vadd.f32 %v608_v34, %v578_v31 }
 0x192   : > { %v542_v57 = vadd.f32 %v1434_v5, %v541_v59  ;;  %v610_v38 = vadd.f32 %v609_v36, %v579_v33  ;;  %v587_v5 = vmul.f32 %v1466_v13, %v1466_v13 }
 0x194   : > { %v543_v63 = vadd.f32 %v542_v57, %v1458_v11  ;;  %v611_v40 = vadd.f32 %v610_v38, %v580_v35 }
 0x196   : > { %v544_v61 = vadd.f32 %v1450_v9, %v543_v63  ;;  %v612_v42 = vadd.f32 %v611_v40, %v581_v37 }
 0x198   : > { %v545_v3 = vadd.f32 %v544_v61, %v1474_v15  ;;  %v613_v44 = vadd.f32 %v612_v42, %v582_v39 }
 0x19a   : > { %v546_v1 = vadd.f32 %v1466_v13, %v545_v3  ;;  %v614_v46 = vadd.f32 %v613_v44, %v583_v41 }
 0x19c   : > { %v547_v7 = vrot.slane %v546_v1, 4  ;;  %v615_v48 = vadd.f32 %v614_v46, %v584_v43 }
 0x19e   : > { %v548_v50 = vadd.f32 %v547_v7, %v546_v1  ;;  %v616_v52 = vadd.f32 %v615_v48, %v585_v45 }
 0x1a0   : > { %v549_v54 = vrot.slane %v548_v50, 2  ;;  %v617_v56 = vadd.f32 %v616_v52, %v586_v47 }
 0x1a2   : > { %v550_v11 = vadd.f32 %v549_v54, %v548_v50  ;;  %v618_v58 = vadd.f32 %v617_v56, %v587_v5 }
 0x1a4   : > { %v551_v60 = vrot.slane %v550_v11, 1  ;;  %v619_v0 = vrot.slane %v618_v58, 4 }
 0x1a6   : > { %v552_v2 = vadd.f32 %v551_v60, %v550_v11  ;;  %v620_v9 = vadd.f32 %v619_v0, %v618_v58 }
 0x1a8   : > { %v553_v6 = vadd.f32 %v552_v2, %v515_v62  ;;  %v621_v16 = vrot.slane %v620_v9, 2 }
 0x1aa   : > { %554 = vst [vmem:[#allocation8] sm:$0x1] %v553_v6  ;;  %v622_v15 = vadd.f32 %v621_v16, %v620_v9 }
 0x1ac   : > { %v623_v4 = vrot.slane %v622_v15, 1 }
 0x1ae   : > { %v624_v13 = vadd.f32 %v623_v4, %v622_v15 }
 0x1b0   : > { %v625_v18 = vadd.f32 %v624_v13, %v555_v17 }
 0x1b2   : > { %626 = vst [vmem:[#allocation8 + $0x1] sm:$0x1] %v625_v18 }
 0x1b3   : > { %1089 = shalt.err (!%p1086_p2)
}
 0x1b4   : > { %p1661_p1 = pmov %p1660_p8 }
 0x1b6   : > { %935 = dma.vmem_to_hbm [thread:$0]  (%p1661_p1), %s656_s26, 32, %s1642_s3, [#allocation9]  }
 0x1b7   : > { %p1662_p4 = pmov %p1661_p1 }
 0x1b8   : > { %p1663_p6 = pmov %p1661_p1 }
 0x1b9   : > { %1125 = dma.done.wait (%p1662_p4), [#allocation9], 32  }
 0x1ba   : > { %1127 = vsyncadd (%p1663_p6), [#allocation9], 4294967264 }
 0x1bb PF: > { %s671_s22 = sand.u32 1, %s1134_s12   ;;  %p1664_p9 = scmp.ne.s32.totalorder %s1648_s19, 0 }
 0x1bc   : > { %p1665_p3 = scmp.ge.s32.totalorder %s1146_s15, 2  ;;  %s672_s25 = scalar_lea.sflag [#allocation4], %s671_s22 }
 0x1be   : > { %p948_p12 = pnand %p1665_p3, %p1664_p9 }
 0x1c0   : > { %p949_p7 = pneg %p948_p12 }
 0x1c2   : > { %1129 = dma.done.wait (%p949_p7), %s672_s25, 4096  }
 0x1c3   : > { %1131 = vsyncadd (%p949_p7), %s672_s25, 4294963200  ;;  %p19_p8 = scmp.ge.s32.totalorder %s1232_s24, 4   ;;  %s1666_s12 = smov %s1138_s13 }
 0x1c4   : > { %s1667_s13 = smov %s1142_s14  ;;  %s1668_s14 = smov %s1252_s5 }
 0x1c5   : > { %s1669_s15 = smov %s1232_s24  ;;  %21 = sbr.rel (!%p19_p8) target bundleno = 7 (0x7), region = 89 }
 0x1ca   :  { %677 = vsyncpa [#allocation3], 1 }
 0x1cb   :  { %679 = vsyncpa [#allocation3 + $0x1], 1 }
 0x1cc   :  { %680 = vsyncpa [#allocation6], 1 }
 0x1cd   :  { %681 = vsyncpa [#allocation4], 1 }
 0x1ce   :  { %683 = vsyncpa [#allocation4 + $0x1], 1 }
 0x1cf   :  { %684 = vsyncpa [#allocation9], 1 }

</bundles_post_ra>
